<compile_context>
chip_gen: v7x
topology: tpu7x:2x2x1
jax: 0.10.0
libtpu: 0.0.40
codegen_flags: <defaults>
</compile_context>

<pallas_src>
import functools

import jax
import jax.numpy as jnp
from jax import lax
from jax.experimental import pallas as pl
from jax.experimental.pallas import tpu as pltpu

_LANE = 128
_TARGET_BLOCK_BYTES = 8 * 1024 * 1024   # per-input HBM bytes per grid step
_CHUNK_ELEMS = 64 * 1024                # elements per inner accumulation chunk
_MAX_BLOCK_COLS = 32768                 # column tiling kicks in above this


def _cdiv(a, b):
    return -(-a // b)


def _round_up(a, b):
    return _cdiv(a, b) * b


def _round_down(a, b):
    return (a // b) * b


def _sublane_pack(itemsize):
    # Packed-sublane granularity: 8 rows f32, 16 rows bf16, 32 rows int8/fp8.
    return max(8, 32 // itemsize)


def _mse_partial_kernel(yt_ref, yp_ref, out_ref, *, chunk_rows, n_chunks,
                        total_rows, total_cols, mask_rows, mask_cols):
    """Per grid step: sum of squared diffs of one (block_rows, block_cols) tile,
    folded to an f32 (chunk_rows, 1) partial (lanes reduced, rows kept)."""
    i = pl.program_id(0)
    block_rows, block_cols = yt_ref.shape
    row0 = i * block_rows

    if mask_rows:
        row_ids = lax.broadcasted_iota(jnp.int32, (chunk_rows, 1), 0)
    if mask_cols:
        col_ids = lax.broadcasted_iota(jnp.int32, (chunk_rows, block_cols), 1)
        valid_cols = total_cols - pl.program_id(1) * block_cols

    def accumulate(r_start, acc):
        yt = yt_ref[pl.ds(r_start, chunk_rows), :].astype(jnp.float32)
        yp = yp_ref[pl.ds(r_start, chunk_rows), :].astype(jnp.float32)
        d = yt - yp
        sq = d * d
        if mask_cols:
            # Kill garbage lanes (only in the rare column-tiled path) before
            # the lane reduction so NaN/Inf garbage cannot poison the sum.
            sq = jnp.where(col_ids < valid_cols, sq, 0.0)
        colsum = jnp.sum(sq, axis=1, keepdims=True)        # (chunk_rows, 1)
        if mask_rows:
            # Garbage rows (partial boundary block) are whole rows -> cheap
            # (chunk_rows, 1) select after the lane reduction kills them.
            valid_rows = total_rows - row0 - r_start
            colsum = jnp.where(row_ids < valid_rows, colsum, 0.0)
        return acc + colsum

    acc0 = jnp.zeros((chunk_rows, 1), jnp.float32)
    if n_chunks == 1:
        acc = accumulate(0, acc0)
    else:
        def body(c, acc):
            r = pl.multiple_of(c * chunk_rows, chunk_rows)
            return accumulate(r, acc)
        acc = lax.fori_loop(0, n_chunks, body, acc0)

    out_ref[...] = acc


def _canonical_2d(x):
    """Copy-free (dim-merging) 2-D view (M, C): C merges trailing dims until
    it is at least one full lane row (or all dims are merged)."""
    if x.ndim == 0:
        return x.reshape(1, 1)
    shape = x.shape
    c = shape[-1]
    k = 1
    while c < _LANE and k < x.ndim:
        k += 1
        c *= shape[-k]
    m = 1
    for d in shape[: x.ndim - k]:
        m *= d
    return x.reshape(m, c)


def _sum_squared_diff(y_true: jax.Array, y_pred: jax.Array) -> jax.Array:
    """Sum of squared differences over all elements, via Pallas (no HBM copies)."""
    assert y_true.shape == y_pred.shape, (y_true.shape, y_pred.shape)
    yt = _canonical_2d(y_true)
    yp = _canonical_2d(y_pred)
    M, C = yt.shape

    it_t = jnp.dtype(yt.dtype).itemsize
    it_p = jnp.dtype(yp.dtype).itemsize
    sub = max(_sublane_pack(it_t), _sublane_pack(it_p))
    max_item = max(it_t, it_p)

    cpad = _round_up(C, _LANE)
    target_elems = _TARGET_BLOCK_BYTES // max_item

    # Column tiling only for pathological very-wide rows; normally block = full C.
    if cpad <= _MAX_BLOCK_COLS:
        block_cols, n_col_tiles = C, 1
    else:
        block_cols = _MAX_BLOCK_COLS
        n_col_tiles = _cdiv(C, block_cols)
    cpad_b = _round_up(block_cols, _LANE)

    # Inner accumulation chunk: bounded f32 temporaries, packed-sublane aligned.
    chunk_rows = max(sub, _round_down(max(_CHUNK_ELEMS // cpad_b, sub), sub))
    chunk_rows = min(chunk_rows, _round_up(max(M, 1), sub))

    # Row block: ~_TARGET_BLOCK_BYTES per input, multiple of chunk_rows, and
    # capped at ceil(M/2) so medium inputs keep >= 2 tiles (v7x megacore).
    desired_rows = max(chunk_rows,
                       _round_down(max(target_elems // cpad_b, chunk_rows),
                                   chunk_rows))
    half_rows = _round_up(_cdiv(max(M, 1), 2), chunk_rows)
    block_rows = max(chunk_rows, min(desired_rows, half_rows))
    block_rows = min(block_rows, _round_up(max(M, 1), chunk_rows))
    n_row_tiles = _cdiv(max(M, 1), block_rows)
    n_chunks = block_rows // chunk_rows

    mask_rows = (n_row_tiles * block_rows) != M
    mask_cols = (n_col_tiles * block_cols) != C

    # VMEM budget: 2 double-buffered inputs + tiny partial output + chunk temps.
    def _buf_bytes(itemsize):
        pr = _round_up(block_rows, _sublane_pack(itemsize))
        return pr * cpad_b * itemsize

    vmem_limit = 2 * (_buf_bytes(it_t) + _buf_bytes(it_p))
    vmem_limit += 2 * _round_up(chunk_rows, 8) * _LANE * 4
    vmem_limit += 8 * chunk_rows * cpad_b * 4
    vmem_limit += 2 * 1024 * 1024
    vmem_limit = int(min(vmem_limit, 96 * 1024 * 1024))

    n_elem = y_true.size
    cost = pl.CostEstimate(
        flops=3 * n_elem,
        transcendentals=0,
        bytes_accessed=int(n_elem * (it_t + it_p)
                           + n_row_tiles * n_col_tiles * chunk_rows * 4),
    )

    kernel = functools.partial(
        _mse_partial_kernel,
        chunk_rows=chunk_rows,
        n_chunks=n_chunks,
        total_rows=M,
        total_cols=C,
        mask_rows=mask_rows,
        mask_cols=mask_cols,
    )

    partials = pl.pallas_call(
        kernel,
        out_shape=jax.ShapeDtypeStruct(
            (n_row_tiles, n_col_tiles, chunk_rows, 1), jnp.float32),
        grid_spec=pltpu.PrefetchScalarGridSpec(
            num_scalar_prefetch=0,
            grid=(n_row_tiles, n_col_tiles),
            in_specs=[
                pl.BlockSpec((block_rows, block_cols), lambda i, j: (i, j)),
                pl.BlockSpec((block_rows, block_cols), lambda i, j: (i, j)),
            ],
            out_specs=pl.BlockSpec((None, None, chunk_rows, 1),
                                   lambda i, j: (i, j, 0, 0)),
        ),
        compiler_params=pltpu.CompilerParams(
            dimension_semantics=("parallel", "parallel"),
            vmem_limit_bytes=vmem_limit,
        ),
        cost_estimate=cost,
    )(yt, yp)

    # Final (tiny) reduction of per-tile partial sums in plain JAX.
    return jnp.sum(partials, dtype=jnp.float32)


def mse_loss(
    y_true: jax.Array,
    y_pred: jax.Array,
    ds_size: float,
    batch_size: int,
    ds_scale: bool = True,
) -> jax.Array:
    """Pallas equivalent of MSE.forward(y_true, y_pred, mouse_id, batch_size)."""
    b = y_true.shape[0]
    n_elem = y_true.size

    ssq = _sum_squared_diff(y_true, y_pred)
    loss = ssq / jnp.float32(n_elem)  # torch.mean(torch.square(...))

    if ds_scale:
        # Criterion.scale_ds: loss *= sqrt(ds_sizes[mouse_id] / batch_size)
        loss = loss * jnp.sqrt(jnp.float32(ds_size) / jnp.float32(batch_size))

    # loss *= y_true.size(0) / batch_size
    loss = loss * (jnp.float32(b) / jnp.float32(batch_size))
    return loss


def _ref_loss(y_true, y_pred, ds_size, batch_size, ds_scale):
    """Pure-JAX reference of the exact PyTorch semantics (f32 accumulation)."""
    ref = jnp.mean(
        jnp.square(y_true.astype(jnp.float32) - y_pred.astype(jnp.float32))
    )
    if ds_scale:
        ref = ref * jnp.sqrt(jnp.float32(ds_size) / jnp.float32(batch_size))
    ref = ref * (jnp.float32(y_true.shape[0]) / jnp.float32(batch_size))
    return ref


if __name__ == "__main__":
    key = jax.random.PRNGKey(0)
    ds_size = 5994.0  # ds_sizes["mouse_A"]
    ds_scale = True

    keys = jax.random.split(key, 8)

    # --- Case 1: small aligned f32 shapes (batch=2, neurons=16, time=128) ---
    B, N, T = 2, 16, 128
    y_true = jax.random.normal(keys[0], (B, N, T), dtype=jnp.float32)
    y_pred = jax.random.normal(keys[1], (B, N, T), dtype=jnp.float32)
    loss = jax.block_until_ready(mse_loss(y_true, y_pred, ds_size, B, ds_scale))
    ref = _ref_loss(y_true, y_pred, ds_size, B, ds_scale)
    assert jnp.allclose(loss, ref, rtol=1e-5, atol=1e-6), (loss, ref)

    # --- Case 2: non-aligned shape (last dim < 128 -> copy-free merged view) ---
    B2, N2, T2 = 2, 17, 100
    y_true2 = jax.random.normal(keys[2], (B2, N2, T2), dtype=jnp.float32)
    y_pred2 = jax.random.normal(keys[3], (B2, N2, T2), dtype=jnp.float32)
    loss2 = jax.block_until_ready(mse_loss(y_true2, y_pred2, ds_size, B2, ds_scale))
    ref2 = _ref_loss(y_true2, y_pred2, ds_size, B2, ds_scale)
    assert jnp.allclose(loss2, ref2, rtol=1e-5, atol=1e-6), (loss2, ref2)

    # --- Case 3: bf16 inputs exercise the in-kernel widening path ---
    y_true3 = jax.random.normal(keys[4], (B, N, T), dtype=jnp.float32).astype(jnp.bfloat16)
    y_pred3 = jax.random.normal(keys[5], (B, N, T), dtype=jnp.float32).astype(jnp.bfloat16)
    loss3 = jax.block_until_ready(mse_loss(y_true3, y_pred3, ds_size, B, ds_scale))
    ref3 = _ref_loss(y_true3, y_pred3, ds_size, B, ds_scale)
    assert jnp.allclose(loss3, ref3, rtol=1e-3, atol=1e-5), (loss3, ref3)

    # --- Case 4: very wide rows exercise column tiling + row/col masking ---
    B4, W4 = 3, 50000
    y_true4 = jax.random.normal(keys[6], (B4, W4), dtype=jnp.float32)
    y_pred4 = jax.random.normal(keys[7], (B4, W4), dtype=jnp.float32)
    loss4 = jax.block_until_ready(mse_loss(y_true4, y_pred4, ds_size, B4, ds_scale))
    ref4 = _ref_loss(y_true4, y_pred4, ds_size, B4, ds_scale)
    assert jnp.allclose(loss4, ref4, rtol=1e-4, atol=1e-5), (loss4, ref4)

    print("KERNEL_OK")
</pallas_src>

<mosaic_0001>
module attributes {stable_mosaic.version = 11 : i64} {
  func.func @_mse_partial_kernel(%arg0: i32, %arg1: i32, %arg2: memref<32x128xf32, #tpu.memory_space<vmem>>, %arg3: memref<32x128xf32, #tpu.memory_space<vmem>>, %arg4: memref<1x1x32x1xf32, #tpu.memory_space<vmem>>) attributes {dimension_semantics = [#tpu.dimension_semantics<parallel>, #tpu.dimension_semantics<parallel>], iteration_bounds = array<i64: 1, 1>, scalar_prefetch = 0 : i64, scratch_operands = 0 : i64, tpu.core_type = #tpu.core_type<tc>, window_params = [{transform_indices = @transform_0, window_bounds = array<i64: 32, 128>}, {transform_indices = @transform_1, window_bounds = array<i64: 32, 128>}, {transform_indices = @transform_2, window_bounds = array<i64: 1, 1, 32, 1>}]} {
    %cst = arith.constant 0.000000e+00 : f32
    %0 = vector.broadcast %cst : f32 to vector<32x1xf32>
    %c0 = arith.constant 0 : index
    %c0_0 = arith.constant 0 : index
    %1 = vector.load %arg2[%c0, %c0_0] : memref<32x128xf32, #tpu.memory_space<vmem>>, vector<32x128xf32>
    %c0_1 = arith.constant 0 : index
    %c0_2 = arith.constant 0 : index
    %2 = vector.load %arg3[%c0_1, %c0_2] : memref<32x128xf32, #tpu.memory_space<vmem>>, vector<32x128xf32>
    %3 = arith.subf %1, %2 : vector<32x128xf32>
    %4 = arith.mulf %3, %3 : vector<32x128xf32>
    %cst_3 = arith.constant dense<0.000000e+00> : vector<32xf32>
    %5 = vector.multi_reduction <add>, %4, %cst_3 [1] : vector<32x128xf32> to vector<32xf32>
    %6 = vector.shape_cast %5 : vector<32xf32> to vector<32x1xf32>
    %7 = arith.addf %0, %6 : vector<32x1xf32>
    %c0_4 = arith.constant 0 : index
    %c0_5 = arith.constant 0 : index
    %c0_6 = arith.constant 0 : index
    %c0_7 = arith.constant 0 : index
    %8 = vector.load %arg4[%c0_4, %c0_5, %c0_6, %c0_7] : memref<1x1x32x1xf32, #tpu.memory_space<vmem>>, vector<1x1x32x1xf32>
    %9 = vector.shape_cast %8 : vector<1x1x32x1xf32> to vector<32x1xf32>
    %10 = vector.shape_cast %7 : vector<32x1xf32> to vector<1x1x32x1xf32>
    tpu.vector_store %arg4[%c0_4, %c0_5, %c0_6, %c0_7], %10 {strides = array<i32>} : memref<1x1x32x1xf32, #tpu.memory_space<vmem>>, vector<1x1x32x1xf32>,
    return
  }
  func.func @transform_0(%arg0: i32, %arg1: i32) -> (i32, i32) {
    %c0_i32 = arith.constant 0 : i32
    return %arg0, %arg1 : i32, i32
  }
  func.func @transform_1(%arg0: i32, %arg1: i32) -> (i32, i32) {
    %c0_i32 = arith.constant 0 : i32
    return %arg0, %arg1 : i32, i32
  }
  func.func @transform_2(%arg0: i32, %arg1: i32) -> (i32, i32, i32, i32) {
    %c0_i32 = arith.constant 0 : i32
    %c0_i32_0 = arith.constant 0 : i32
    %c0_i32_1 = arith.constant 0 : i32
    return %arg0, %arg1, %c0_i32, %c0_i32_0 : i32, i32, i32, i32
  }
}

</mosaic_0001>

<bundles_post_ra>
// kernel: tpu_custom_call.1
= control target key start
LH: loop header
LB: loop body
LE: loop exit
PB: predicated region body
PF: predicated region fallthrough
CT: control target
= control target key end

     0   :  { %7 = vsyncpa [#allocation3], 0  ;;  %s185_s0 = inlined_call_operand.hbm [shape: f32[32,128], index: 0, kind: input, shape index: {}]   ;;  %s186_s1 = inlined_call_operand.hbm [shape: f32[32,128], index: 1, kind: input, shape index: {}]   ;;  %s187_s2 = inlined_call_operand.vmem [shape: f32[1,1,32,1], index: 2, kind: output, shape index: {}]  }
   0x1   :  { %8 = vsyncpa [#allocation5], 0  ;;  %s130_s9 = smov [#allocation2]   ;;  %s82_s13 = scalar_lea.hbm %s185_s0, 512 }
   0x2   :  { %s14_s10 = sshll.u32 %s130_s9, 4  ;;  %p83_p0 = scmp.ne.s32.totalorder %s185_s0, %s82_s13  ;;  %s15_s10 = int_to_ptr.vmem [resolvable:$true] %s14_s10 }
   0x3   :  { %p86_p1 = scmp.lt.u32.totalorder %s82_s13, %s185_s0 }
   0x5   :  { %p88_p2 = pnand %p86_p1, %p83_p0 }
   0x7   :  { %91 = shalt.err (!%p88_p2)
}
   0x8   :  { %s92_s18 = scalar_lea.vmem %s15_s10, 512  ;;  %p97_p4 = scmp.lt.s32.totalorder %s15_s10, %s15_s10 }
   0x9   :  { %p93_p3 = scmp.ne.s32.totalorder %s15_s10, %s92_s18  ;;  %p98_p5 = scmp.lt.s32.totalorder %s92_s18, %s92_s18 }
   0xb   :  { %p99_p6 = por %p98_p5, %p97_p4 }
   0xd   :  { %p100_p7 = pnand %p99_p6, %p93_p3 }
   0xf   :  { %103 = shalt.err (!%p100_p7)
}
  0x10   :  { %s131_s19 = smov 128   ;;  %s132_s20 = smov 8  }
  0x11   :  { %20 = dma.hbm_to_vmem [thread:$0]  %s185_s0, 512, %s15_s10, [#allocation3], %s131_s19, %s131_s19, %s132_s20  }
  0x12   :  { %s133_s23 = smov [#allocation4]   ;;  %s104_s27 = scalar_lea.hbm %s186_s1, 512 }
  0x13   :  { %s26_s24 = sshll.u32 %s133_s23, 4  ;;  %p105_p8 = scmp.ne.s32.totalorder %s186_s1, %s104_s27  ;;  %s27_s24 = int_to_ptr.vmem [resolvable:$true] %s26_s24 }
  0x14   :  { %p108_p9 = scmp.lt.u32.totalorder %s104_s27, %s186_s1 }
  0x16   :  { %p110_p10 = pnand %p108_p9, %p105_p8 }
  0x18   :  { %113 = shalt.err (!%p110_p10)
}
  0x19   :  { %s114_s4 = scalar_lea.vmem %s27_s24, 512  ;;  %p119_p12 = scmp.lt.s32.totalorder %s27_s24, %s27_s24 }
  0x1a   :  { %p115_p11 = scmp.ne.s32.totalorder %s27_s24, %s114_s4  ;;  %p120_p13 = scmp.lt.s32.totalorder %s114_s4, %s114_s4 }
  0x1c   :  { %p121_p0 = por %p120_p13, %p119_p12 }
  0x1e   :  { %p122_p1 = pnand %p121_p0, %p115_p11 }
  0x20   :  { %125 = shalt.err (!%p122_p1)
}
  0x21   :  { %32 = dma.hbm_to_vmem [thread:$0]  %s186_s1, 512, %s27_s24, [#allocation5], %s131_s19, %s131_s19, %s132_s20  }
  0x22   :  { %126 = dma.done.wait [#allocation3], 512  }
  0x23   :  { %127 = vsyncadd [#allocation3], 4294966784 }
  0x24   :  { %128 = dma.done.wait [#allocation5], 512  }
  0x25   :  { %129 = vsyncadd [#allocation5], 4294966784  ;;  %v41_v0 = vld [vmem:[#allocation2 + $0x10] sm:$0xff]  ;;  %v39_v2 = vld [vmem:[#allocation2] sm:$0xff]  ;;  %vm67_vm0 = vcmask 7168  }
  0x26   :  { %v45_v1 = vld [vmem:[#allocation4 + $0x10] sm:$0xff]  ;;  %v43_v4 = vld [vmem:[#allocation4] sm:$0xff]  ;;  %v42_v5 = vld [vmem:[#allocation2 + $0x18] sm:$0xff] }
  0x27   :  { %v49_v3 = vsub.f32 %v41_v0, %v45_v1  ;;  %v46_v6 = vld [vmem:[#allocation4 + $0x18] sm:$0xff]  ;;  %v47_v7 = vsub.f32 %v39_v2, %v43_v4  ;;  %v40_v9 = vld [vmem:[#allocation2 + $0x8] sm:$0xff] }
  0x28   :  { %v50_v8 = vsub.f32 %v42_v5, %v46_v6  ;;  %v44_v10 = vld [vmem:[#allocation4 + $0x8] sm:$0xff] }
  0x29   :  { %v53_v11 = vmul.f32 %v49_v3, %v49_v3  ;;  %v48_v12 = vsub.f32 %v40_v9, %v44_v10  ;;  %v51_v13 = vmul.f32 %v47_v7, %v47_v7 }
  0x2a   :  { %v54_v14 = vmul.f32 %v50_v8, %v50_v8 }
  0x2b   :  { %59 = vadd.xlane.f32.xlu1 %v53_v11  ;;  %55 = vadd.xlane.f32.xlu0 %v51_v13  ;;  %v52_v15 = vmul.f32 %v48_v12, %v48_v12 }
  0x2f   :  { %61 = vadd.xlane.f32.xlu1 %v54_v14  ;;  %57 = vadd.xlane.f32.xlu0 %v52_v15 }
  0xb8   :  { %v60_v16 = vpop.xlane.xlu1 %59  ;;  %v56_v17 = vpop.xlane.xlu0 %55 }
  0xb9   :  { %70 = vst.msk [vmem:[%s187_s2 + $0x10] sm:$0xff] %vm67_vm0, %v60_v16  ;;  %68 = vst.msk [vmem:[%s187_s2] sm:$0xff] %vm67_vm0, %v56_v17 }
  0xbc   :  { %v62_v18 = vpop.xlane.xlu1 %61  ;;  %v58_v19 = vpop.xlane.xlu0 %57 }
  0xbd   :  { %71 = vst.msk [vmem:[%s187_s2 + $0x18] sm:$0xff] %vm67_vm0, %v62_v18  ;;  %69 = vst.msk [vmem:[%s187_s2 + $0x8] sm:$0xff] %vm67_vm0, %v58_v19 }
  0xbe   :  { %76 = vsyncpa [#allocation3], 1 }
  0xbf   :  { %77 = vsyncpa [#allocation5], 1 }

</bundles_post_ra>
